<compile_context>
chip_gen: v7x
topology: tpu7x:2x2x1
jax: 0.10.0
libtpu: 0.0.40
codegen_flags: <defaults>
</compile_context>

<pallas_src>
import functools
import math

import jax
import jax.numpy as jnp
from jax.experimental import pallas as pl
from jax.experimental.pallas import tpu as pltpu

WORLD_SIZE = 1    # single-device simulation of DistEnv
LANE = 128        # TPU lane width; padded width of h / output slabs


# ------------------------------ helpers ----------------------------------- #
def _pick_row_tile(n):
    for cand in (128, 64, 32, 16, 8):
        if n % cand == 0:
            return cand
    return n


def _vmem_budget_bytes():
    # Per-generation budget: 64 MiB on v7x vs 128 MiB on v5e/v6e; keep headroom.
    try:
        cap = int(pltpu.get_tpu_info().vmem_capacity_bytes)
    except Exception:
        cap = 64 * 2**20
    return (cap * 3) // 4


def xavier_uniform(key, shape):
    fan_in, fan_out = shape
    a = math.sqrt(6.0 / (fan_in + fan_out))
    return jax.random.uniform(key, shape, jnp.float32, minval=-a, maxval=a)


# ------------------------------ kernels ------------------------------------ #
def _mlp_kernel(*refs, nlayers):
    """DistNNLayer stack: h = relu(h @ W_i); ReLU skipped after the last layer.

    Intermediate widths stay at their real (small) sizes; only the final
    output is 128 lanes wide (last weight zero-padded on its output dim), so
    the single store is lane-dense and bit-identical to the unpadded math.
    """
    feat_ref = refs[0]
    w_refs = refs[1:1 + nlayers]
    o_ref = refs[1 + nlayers]

    h = feat_ref[...]
    for i in range(nlayers):
        h = jnp.dot(h, w_refs[i][...],
                    preferred_element_type=jnp.float32,
                    precision=jax.lax.Precision.HIGHEST)
        if i != nlayers - 1:
            h = jnp.maximum(h, 0.0)          # ReLU on the f32 accumulator
    o_ref[...] = h.astype(o_ref.dtype)       # bf16 slab consumed by the spmm


def _spmm_hops_kernel(h0_ref, adj_ref, dinv_ref, o_ref, ha_ref, hb_ref, *, tm):
    """DistGraphLayer stack.  grid = (hop, row_tile), both sequential.

    out_rows = dinv * (A01_tile @ h_prev): A01 is the raw 0/1 adjacency (exact
    in bf16), dinv folds the 1/deg row normalization back in f32 (exact).
    h ping-pongs between two VMEM slabs: read ha, write hb, swap at hop end.
    split()/gather() are identities at world_size == 1.
    """
    hop = pl.program_id(0)
    i = pl.program_id(1)
    n_tiles = pl.num_programs(1)

    @pl.when(jnp.logical_and(hop == 0, i == 0))
    def _():
        ha_ref[...] = h0_ref[...]             # seed hop 0 with the MLP output

    acc = jnp.dot(adj_ref[...], ha_ref[...],
                  preferred_element_type=jnp.float32)     # bf16 x bf16 -> f32
    acc = acc * dinv_ref[...]                 # exact per-row 1/deg scale (f32)

    o_ref[...] = acc                          # lane-dense f32 store; final hop wins
    row0 = pl.multiple_of(i * tm, tm)
    hb_ref[pl.ds(row0, tm), :] = acc.astype(jnp.bfloat16)

    @pl.when(i == n_tiles - 1)
    def _():
        ha_ref[...] = hb_ref[...]             # hand this hop's h to the next hop


# ------------------------------ wrappers ----------------------------------- #
def mlp_forward(features, weights, tm):
    n, in_dim = features.shape
    nlayers = len(weights)
    assert n % tm == 0
    w_specs = [pl.BlockSpec(w.shape, lambda i: (0, 0)) for w in weights]
    return pl.pallas_call(
        functools.partial(_mlp_kernel, nlayers=nlayers),
        out_shape=jax.ShapeDtypeStruct((n, LANE), jnp.bfloat16),
        grid=(n // tm,),
        in_specs=[pl.BlockSpec((tm, in_dim), lambda i: (i, 0))] + w_specs,
        out_specs=pl.BlockSpec((tm, LANE), lambda i: (i, 0)),
        compiler_params=pltpu.CompilerParams(
            dimension_semantics=("parallel",)),
    )(features, *weights)


def spmm_hops(h0_bf16, adj01_bf16, dinv, nlayers, tm):
    n, lane = h0_bf16.shape
    assert adj01_bf16.shape == (n, n) and dinv.shape == (n, 1)
    assert n % tm == 0
    n_tiles = n // tm

    # Size the scoped-VMEM limit from the actual buffers (double-buffered).
    vmem_needed = (2 * tm * n * 2            # streamed adj tile (bf16) x2
                   + 2 * n * lane * 2        # resident h0 (bf16)
                   + 2 * tm * LANE * 4       # dinv (lane padded) x2
                   + 2 * tm * lane * 4       # output tile x2
                   + 2 * n * lane * 2)       # ha + hb scratch
    budget = _vmem_budget_bytes()
    if vmem_needed > budget:
        # TODO(synk): past this size h must also be streamed (tiled over its
        #             node axis inside each hop), not kept VMEM-resident.
        raise ValueError(f"graph too large for resident-h spmm: need "
                         f"{vmem_needed} B, budget {budget} B")
    vmem_limit = int(min(budget, max(32 * 2**20, 2 * vmem_needed)))

    flops = 2 * nlayers * n * n * lane
    bytes_accessed = (nlayers * n * n * 2       # adj streamed once per hop
                      + n * lane * 2            # h0
                      + n * lane * 4            # output
                      + nlayers * n * 4)        # dinv

    return pl.pallas_call(
        functools.partial(_spmm_hops_kernel, tm=tm),
        out_shape=jax.ShapeDtypeStruct((n, lane), jnp.float32),
        grid=(nlayers, n_tiles),
        in_specs=[
            pl.BlockSpec((n, lane), lambda h, i: (0, 0)),   # h0: resident
            pl.BlockSpec((tm, n), lambda h, i: (i, 0)),     # adj: streamed rows
            pl.BlockSpec((tm, 1), lambda h, i: (i, 0)),     # 1/deg per row
        ],
        out_specs=pl.BlockSpec((tm, lane), lambda h, i: (i, 0)),
        scratch_shapes=[pltpu.VMEM((n, lane), jnp.bfloat16),
                        pltpu.VMEM((n, lane), jnp.bfloat16)],
        compiler_params=pltpu.CompilerParams(
            dimension_semantics=("arbitrary", "arbitrary"),
            vmem_limit_bytes=vmem_limit),
        cost_estimate=pl.CostEstimate(flops=int(flops), transcendentals=0,
                                      bytes_accessed=int(bytes_accessed)),
    )(h0_bf16, adj01_bf16, dinv)


# ----------------------------- model wrapper -------------------------------- #
class TensplitGCNPallas:
    def __init__(self, in_dim, num_classes, hidden_dim=16, nlayers=2,
                 key=jax.random.PRNGKey(0)):
        self.nlayers = nlayers
        self.num_classes = num_classes
        dims = [in_dim] + [hidden_dim] * (nlayers - 1) + [num_classes]
        keys = jax.random.split(key, nlayers)
        self.weights = [xavier_uniform(keys[i], (dims[i], dims[i + 1]))
                        for i in range(nlayers)]

        # Pad ONLY the last weight's output (lane) dim to 128 with zero columns
        # (exact); input (K) dims keep their real sizes.
        last = self.weights[-1]
        padded_last = jnp.zeros((dims[-2], LANE), jnp.float32)
        padded_last = padded_last.at[:, :num_classes].set(last)
        self.kernel_weights = list(self.weights[:-1]) + [padded_last]

    def __call__(self, features, adj01, tm=None):
        n = features.shape[0]
        if tm is None:
            tm = _pick_row_tile(n)
        # adj01 has exact 0/1 entries -> bf16 representation is exact;
        # the 1/deg row normalization is applied inside the kernel in f32.
        deg = jnp.sum(adj01.astype(jnp.float32), axis=1, keepdims=True)
        dinv = 1.0 / deg
        adj_bf16 = adj01.astype(jnp.bfloat16)

        h0 = mlp_forward(features, self.kernel_weights, tm)
        out_padded = spmm_hops(h0, adj_bf16, dinv, self.nlayers, tm)
        # Module semantics: return [N, num_classes].  The world_size pad/strip
        # of the reference is an exact identity at world_size == 1.
        # TODO(synk): large-N consumers should take the lane-dense 128-wide
        #             slab (or fuse their epilogue) instead of this narrowing slice.
        return out_padded[:, :self.num_classes]


# --------------------------------- main ------------------------------------- #
if __name__ == "__main__":
    IN_DIM = 32
    HIDDEN = 16
    NUM_CLASSES = 8
    NLAYERS = 2

    root = jax.random.PRNGKey(0)
    k_graph_a, k_graph_b, k_w = jax.random.split(root, 3)

    def build_graph(key, n_nodes, in_dim):
        kf, ka = jax.random.split(key)
        feats = jax.random.normal(kf, (n_nodes, in_dim), dtype=jnp.float32)
        raw = jax.random.uniform(ka, (n_nodes, n_nodes))
        a = (raw < 0.1).astype(jnp.float32)
        a = jnp.clip(a + a.T + jnp.eye(n_nodes, dtype=jnp.float32), 0.0, 1.0)
        return feats, a                      # exact 0/1 adjacency w/ self loops

    def reference(feats, adj01, weights, nlayers):
        # Plain-JAX f32 replica of TensplitGCN.forward at world_size == 1.
        ref = feats
        for i, w in enumerate(weights):
            ref = ref @ w
            if i != nlayers - 1:
                ref = jnp.maximum(ref, 0.0)
        dim_diff = WORLD_SIZE - ref.shape[1] % WORLD_SIZE
        ref = jnp.concatenate(
            [ref, jnp.zeros((ref.shape[0], dim_diff), ref.dtype)], axis=1)
        adj_norm = adj01 / jnp.sum(adj01, axis=1, keepdims=True)
        for _ in range(nlayers):
            ref = adj_norm @ ref
        return ref[:, :-dim_diff]

    model = TensplitGCNPallas(IN_DIM, NUM_CLASSES, hidden_dim=HIDDEN,
                              nlayers=NLAYERS, key=k_w)

    # (1) small single-tile case; (2) multi-tile case exercising the streamed
    # adjacency grid and the ping-pong hop scratch.
    cases = [(k_graph_a, 64, None), (k_graph_b, 256, 128)]
    for k_graph, n_nodes, tm in cases:
        feats, adj01 = build_graph(k_graph, n_nodes, IN_DIM)
        out = model(feats, adj01, tm=tm)
        out = jax.block_until_ready(out)
        assert out.shape == (n_nodes, NUM_CLASSES), out.shape
        assert out.dtype == jnp.float32

        ref = reference(feats, adj01, model.weights, NLAYERS)
        # bf16 spmm inputs (f32 accumulation) -> relaxed tolerance per review.
        assert jnp.allclose(out, ref, atol=5e-2, rtol=5e-2), (
            f"N={n_nodes}: max|diff|={float(jnp.max(jnp.abs(out - ref)))}")

    print("KERNEL_OK")
</pallas_src>

<mosaic_0001>
module attributes {stable_mosaic.version = 11 : i64} {
  func.func @_mlp_kernel(%arg0: i32, %arg1: memref<64x32xf32, #tpu.memory_space<vmem>>, %arg2: memref<32x16xf32, #tpu.memory_space<vmem>>, %arg3: memref<16x128xf32, #tpu.memory_space<vmem>>, %arg4: memref<64x128xbf16, #tpu.memory_space<vmem>>) attributes {dimension_semantics = [#tpu.dimension_semantics<parallel>], iteration_bounds = array<i64: 1>, scalar_prefetch = 0 : i64, scratch_operands = 0 : i64, tpu.core_type = #tpu.core_type<tc>, window_params = [{transform_indices = @transform_0, window_bounds = array<i64: 64, 32>}, {pipeline_mode = #tpu.pipeline_mode<synchronous>, transform_indices = @transform_1, window_bounds = array<i64: 32, 16>}, {pipeline_mode = #tpu.pipeline_mode<synchronous>, transform_indices = @transform_2, window_bounds = array<i64: 16, 128>}, {transform_indices = @transform_3, window_bounds = array<i64: 64, 128>}]} {
    %c0 = arith.constant 0 : index
    %c0_0 = arith.constant 0 : index
    %0 = vector.load %arg1[%c0, %c0_0] : memref<64x32xf32, #tpu.memory_space<vmem>>, vector<64x32xf32>
    %c0_1 = arith.constant 0 : index
    %c0_2 = arith.constant 0 : index
    %1 = vector.load %arg2[%c0_1, %c0_2] : memref<32x16xf32, #tpu.memory_space<vmem>>, vector<32x16xf32>
    %cst = arith.constant dense<0.000000e+00> : vector<64x16xf32>
    %2 = tpu.matmul %0, %1, %cst {dimension_numbers = #tpu.dot_dimension_numbers<[1], [0], [0], [1], [0, 0, 1, 1], [], []>, precision = #tpu.contract_precision<fp32>} : vector<64x32xf32>, vector<32x16xf32>, vector<64x16xf32> -> vector<64x16xf32>
    %cst_3 = arith.constant 0.000000e+00 : f32
    %3 = vector.broadcast %cst_3 : f32 to vector<64x16xf32>
    %4 = arith.maximumf %2, %3 : vector<64x16xf32>
    %c0_4 = arith.constant 0 : index
    %c0_5 = arith.constant 0 : index
    %5 = vector.load %arg3[%c0_4, %c0_5] : memref<16x128xf32, #tpu.memory_space<vmem>>, vector<16x128xf32>
    %cst_6 = arith.constant dense<0.000000e+00> : vector<64x128xf32>
    %6 = tpu.matmul %4, %5, %cst_6 {dimension_numbers = #tpu.dot_dimension_numbers<[1], [0], [0], [1], [0, 0, 1, 1], [], []>, precision = #tpu.contract_precision<fp32>} : vector<64x16xf32>, vector<16x128xf32>, vector<64x128xf32> -> vector<64x128xf32>
    %7 = arith.truncf %6 : vector<64x128xf32> to vector<64x128xbf16>
    %c0_7 = arith.constant 0 : index
    %c0_8 = arith.constant 0 : index
    %8 = vector.load %arg4[%c0_7, %c0_8] : memref<64x128xbf16, #tpu.memory_space<vmem>>, vector<64x128xbf16>
    tpu.vector_store %arg4[%c0_7, %c0_8], %7 {strides = array<i32>} : memref<64x128xbf16, #tpu.memory_space<vmem>>, vector<64x128xbf16>,
    return
  }
  func.func @transform_0(%arg0: i32) -> (i32, i32) {
    %c0_i32 = arith.constant 0 : i32
    %c0_i32_0 = arith.constant 0 : i32
    return %arg0, %c0_i32 : i32, i32
  }
  func.func @transform_1(%arg0: i32) -> (i32, i32) {
    %c0_i32 = arith.constant 0 : i32
    %c0_i32_0 = arith.constant 0 : i32
    %c0_i32_1 = arith.constant 0 : i32
    return %c0_i32, %c0_i32_0 : i32, i32
  }
  func.func @transform_2(%arg0: i32) -> (i32, i32) {
    %c0_i32 = arith.constant 0 : i32
    %c0_i32_0 = arith.constant 0 : i32
    %c0_i32_1 = arith.constant 0 : i32
    return %c0_i32, %c0_i32_0 : i32, i32
  }
  func.func @transform_3(%arg0: i32) -> (i32, i32) {
    %c0_i32 = arith.constant 0 : i32
    %c0_i32_0 = arith.constant 0 : i32
    return %arg0, %c0_i32 : i32, i32
  }
}

</mosaic_0001>

<bundles_post_ra>
// kernel: tpu_custom_call.1
= control target key start
LH: loop header
LB: loop body
LE: loop exit
PB: predicated region body
PF: predicated region fallthrough
CT: control target
= control target key end

     0   :  { %vm27_vm0 = vcmask 261120   ;;  %s2599_s0 = inlined_call_operand.vmem [shape: f32[64,32], index: 0, kind: input, shape index: {}]   ;;  %s2600_s1 = inlined_call_operand.vmem [shape: f32[32,16], index: 1, kind: input, shape index: {}]   ;;  %s2601_s2 = inlined_call_operand.vmem [shape: f32[16,128], index: 2, kind: input, shape index: {}]   ;;  %s2602_s3 = inlined_call_operand.hbm [shape: bf16[64,128], index: 3, kind: output, shape index: {}]  }
   0x1   :  { %v23_v0 = vld [vmem:[%s2600_s1] sm:$0xff]  ;;  %v24_v1 = vld [vmem:[%s2600_s1 + $0x8] sm:$0xff]  ;;  %v25_v2 = vld [vmem:[%s2600_s1 + $0x10] sm:$0xff] }
   0x2   :  { %v53_v3 = vand.u32 4294901760, %v23_v0  ;;  %v56_v4 = vand.u32 4294901760, %v24_v1  ;;  %v26_v5 = vld [vmem:[%s2600_s1 + $0x18] sm:$0xff]  ;;  %v59_v6 = vand.u32 4294901760, %v25_v2  ;;  %v15_v7 = vld [vmem:[%s2599_s0] sm:$0xff]  ;;  %v16_v8 = vld [vmem:[%s2599_s0 + $0x8] sm:$0xff] }
   0x3   :  { %v62_v9 = vand.u32 4294901760, %v26_v5  ;;  %v29_v10 = vsel %vm27_vm0, %v15_v7, 0  ;;  %v32_v11 = vsel %vm27_vm0, %v16_v8, 0  ;;  %v17_v12 = vld [vmem:[%s2599_s0 + $0x10] sm:$0xff]  ;;  %v18_v13 = vld [vmem:[%s2599_s0 + $0x18] sm:$0xff]  ;;  %v19_v18 = vld [vmem:[%s2599_s0 + $0x20] sm:$0xff] }
   0x4   :  { %v2304_v14 = vpack.c.bf16 %v56_v4, %v53_v3  ;;  %v2306_v15 = vand.u32 4294901760, %v29_v10  ;;  %v2308_v16 = vand.u32 4294901760, %v32_v11  ;;  %v2310_v17 = vsub.f32 %v23_v0, %v53_v3  ;;  %v20_v19 = vld [vmem:[%s2599_s0 + $0x28] sm:$0xff] }
   0x5   :  { %v2318_v20 = vpack.c.bf16 %v62_v9, %v59_v6  ;;  %v2320_v21 = vsub.f32 %v24_v1, %v56_v4  ;;  %v35_v22 = vsel %vm27_vm0, %v17_v12, 0  ;;  %v38_v23 = vsel %vm27_vm0, %v18_v13, 0 }
   0x6   :  { %8 = vsyncpa [#allocation3], 0  ;;  %2077 = vmatprep.subr.bf16.mxu0 %v2304_v14  ;;  %v2326_v24 = vsub.f32 %v29_v10, %v2306_v15  ;;  %v2329_v25 = vsub.f32 %v32_v11, %v2308_v16  ;;  %v204_v26 = vand.u32 4294901760, %v2310_v17  ;;  %v2332_v27 = vand.u32 4294901760, %v35_v22  ;;  %v21_v48 = vld [vmem:[%s2599_s0 + $0x30] sm:$0xff]  ;;  %v22_v57 = vld [vmem:[%s2599_s0 + $0x38] sm:$0xff] }
   0x7   :  { %2079 = vmatpush3.bf16.msra.mxu0 %v2304_v14  ;;  %v211_v28 = vand.u32 4294901760, %v2320_v21  ;;  %v2336_v29 = vand.u32 4294901760, %v38_v23  ;;  %v41_v30 = vsel %vm27_vm0, %v19_v18, 0  ;;  %v44_v31 = vsel %vm27_vm0, %v20_v19, 0 }
   0x8   :  { %2081 = vmatprep.subr.bf16.mxu0 %v2318_v20  ;;  %v123_v32 = vand.u32 4294901760, %v2326_v24  ;;  %v133_v33 = vand.u32 4294901760, %v2329_v25  ;;  %v205_v34 = vsub.f32 %v2310_v17, %v204_v26  ;;  %v2347_v35 = vsub.f32 %v35_v22, %v2332_v27 }
   0x9   :  { %v212_v36 = vsub.f32 %v2320_v21, %v211_v28  ;;  %v2353_v37 = vsub.f32 %v38_v23, %v2336_v29  ;;  %v2355_v38 = vand.u32 4294901760, %v41_v30  ;;  %v2357_v39 = vand.u32 4294901760, %v44_v31 }
   0xa   :  { %v124_v40 = vsub.f32 %v2326_v24, %v123_v32  ;;  %v134_v41 = vsub.f32 %v2329_v25, %v133_v33  ;;  %v206_v42 = vand.u32 4294901760, %v205_v34  ;;  %v143_v43 = vand.u32 4294901760, %v2347_v35 }
   0xb   :  { %2083 = vmatpush3.bf16.msra.mxu0 %v2318_v20  ;;  %v213_v44 = vand.u32 4294901760, %v212_v36  ;;  %v153_v45 = vand.u32 4294901760, %v2353_v37  ;;  %v2369_v46 = vsub.f32 %v41_v30, %v2355_v38  ;;  %v2372_v47 = vsub.f32 %v44_v31, %v2357_v39 }
   0xc   :  { %v125_v49 = vand.u32 4294901760, %v124_v40  ;;  %v135_v50 = vand.u32 4294901760, %v134_v41  ;;  %v144_v51 = vsub.f32 %v2347_v35, %v143_v43  ;;  %v2380_v52 = vsub.f32 %v25_v2, %v59_v6 }
   0xd   :  { %v2084_v53 = vpack.c.bf16 %v213_v44, %v206_v42  ;;  %v154_v54 = vsub.f32 %v2353_v37, %v153_v45  ;;  %v163_v55 = vand.u32 4294901760, %v2369_v46  ;;  %v173_v56 = vand.u32 4294901760, %v2372_v47 }
   0xe   :  { %1868 = vmatprep.mubr.f32.mxu0 %v125_v49  ;;  %v145_v58 = vand.u32 4294901760, %v144_v51  ;;  %v218_v59 = vand.u32 4294901760, %v2380_v52  ;;  %v2391_v60 = vsub.f32 %v26_v5, %v62_v9  ;;  %v47_v61 = vsel %vm27_vm0, %v21_v48, 0 }
   0xf   :  { %1869 = vmatmul.mubr.f32.vlgmr.msra.gmra.mrb[0].mxu0 %v135_v50  ;;  %2085 = vmatprep.subr.bf16.mxu0 %v2084_v53  ;;  %v155_v62 = vand.u32 4294901760, %v154_v54  ;;  %v164_v63 = vsub.f32 %v2369_v46, %v163_v55  ;;  %v174_v0 = vsub.f32 %v2372_v47, %v173_v56  ;;  %v2400_v1 = vand.u32 4294901760, %v47_v61 }
  0x10   :  { %2087 = vmatpush3.bf16.msra.mxu0 %v2084_v53  ;;  %1871 = vmatprep.mubr.f32.mxu0 %v145_v58  ;;  %v219_v2 = vsub.f32 %v2380_v52, %v218_v59  ;;  %v225_v3 = vand.u32 4294901760, %v2391_v60  ;;  %v50_v4 = vsel %vm27_vm0, %v22_v57, 0  ;;  %v2092_v23 = vpack.c.bf16 %v2320_v21, %v2310_v17 }
  0x11   :  { %v165_v5 = vand.u32 4294901760, %v164_v63  ;;  %v182_v6 = vsub.f32 %v47_v61, %v2400_v1  ;;  %v2408_v7 = vand.u32 4294901760, %v50_v4  ;;  %v175_v10 = vand.u32 4294901760, %v174_v0 }
  0x12   :  { %v220_v8 = vand.u32 4294901760, %v219_v2  ;;  %v226_v9 = vsub.f32 %v2391_v60, %v225_v3  ;;  %v2096_v36 = vpack.c.bf16 %v2391_v60, %v2380_v52  ;;  %v2108_v40 = vpack.c.bf16 %v211_v28, %v204_v26 }
  0x13   :  { %1872 = vmatmul.mubr.f32.gmra.mrb[2].mxu0 %v155_v62  ;;  %v183_v11 = vand.u32 4294901760, %v182_v6  ;;  %v192_v12 = vsub.f32 %v50_v4, %v2408_v7  ;;  %v2112_v17 = vpack.c.bf16 %v225_v3, %v218_v59  ;;  %vm848_vm1 = vcmask 130048  }
  0x14   :  { %1874 = vmatprep.mubr.f32.mxu0 %v165_v5  ;;  %v227_v13 = vand.u32 4294901760, %v226_v9 }
  0x15   :  { %v184_v18 = vsub.f32 %v182_v6, %v183_v11  ;;  %v193_v19 = vand.u32 4294901760, %v192_v12 }
  0x16   :  { %v2088_v22 = vpack.c.bf16 %v227_v13, %v220_v8 }
  0x17   :  { %1875 = vmatmul.mubr.f32.gmra.mrb[4].mxu0 %v175_v10  ;;  %v185_v30 = vand.u32 4294901760, %v184_v18  ;;  %v194_v31 = vsub.f32 %v192_v12, %v193_v19 }
  0x18   :  { %2089 = vmatprep.subr.bf16.mxu0 %v2088_v22 }
  0x19   :  { %2091 = vmatpush3.bf16.msra.mxu0 %v2088_v22  ;;  %1877 = vmatprep.mubr.f32.mxu0 %v185_v30  ;;  %v195_v34 = vand.u32 4294901760, %v194_v31 }
  0x1a   :  { %2093 = vmatprep.subr.bf16.mxu0 %v2092_v23 }
  0x1b   :  { %1878 = vmatmul.mubr.f32.gmra.mrb[6].mxu0 %v195_v34 }
  0x1c   :  { %1888 = vmatprep.mubr.f32.mxu0 %v2306_v15 }
  0x1f   :  { %1889 = vmatmul.mubr.f32.vlgmr.msra.gmra.mrb[0].mxu0 %v2308_v16 }
  0x20   :  { %2095 = vmatpush3.bf16.msra.mxu0 %v2092_v23  ;;  %1891 = vmatprep.mubr.f32.mxu0 %v2332_v27 }
  0x21   :  { %2097 = vmatprep.subr.bf16.mxu0 %v2096_v36 }
  0x23   :  { %1892 = vmatmul.mubr.f32.gmra.mrb[2].mxu0 %v2336_v29 }
  0x24   :  { %1894 = vmatprep.mubr.f32.mxu0 %v2355_v38  ;;  %2099 = vmatpush3.bf16.msra.mxu0 %v2096_v36 }
  0x25   :  { %2101 = vmatprep.subr.bf16.mxu0 %v2304_v14 }
  0x27   :  { %1895 = vmatmul.mubr.f32.gmra.mrb[4].mxu0 %v2357_v39 }
  0x28   :  { %1897 = vmatprep.mubr.f32.mxu0 %v2400_v1 }
  0x2b   :  { %1898 = vmatmul.mubr.f32.gmra.mrb[6].mxu0 %v2408_v7 }
  0x2c   :  { %1908 = vmatprep.mubr.f32.mxu0 %v2326_v24 }
  0x2f   :  { %1909 = vmatmul.mubr.f32.vlgmr.msra.gmra.mrb[0].mxu0 %v2329_v25 }
  0x30   :  { %2103 = vmatpush3.bf16.msra.mxu0 %v2304_v14  ;;  %1911 = vmatprep.mubr.f32.mxu0 %v2347_v35 }
  0x31   :  { %2105 = vmatprep.subr.bf16.mxu0 %v2318_v20 }
  0x33   :  { %1912 = vmatmul.mubr.f32.gmra.mrb[2].mxu0 %v2353_v37 }
  0x34   :  { %1914 = vmatprep.mubr.f32.mxu0 %v2369_v46  ;;  %2107 = vmatpush3.bf16.msra.mxu0 %v2318_v20 }
  0x35   :  { %2109 = vmatprep.subr.bf16.mxu0 %v2108_v40 }
  0x37   :  { %1915 = vmatmul.mubr.f32.gmra.mrb[4].mxu0 %v2372_v47 }
  0x38   :  { %1917 = vmatprep.mubr.f32.mxu0 %v182_v6 }
  0x3b   :  { %1918 = vmatmul.mubr.f32.gmra.mrb[6].mxu0 %v192_v12 }
  0x3c   :  { %1928 = vmatprep.mubr.f32.mxu0 %v123_v32 }
  0x3f   :  { %1929 = vmatmul.mubr.f32.vlgmr.msra.gmra.mrb[0].mxu0 %v133_v33 }
  0x40   :  { %2111 = vmatpush3.bf16.msra.mxu0 %v2108_v40  ;;  %1931 = vmatprep.mubr.f32.mxu0 %v143_v43 }
  0x41   :  { %2113 = vmatprep.subr.bf16.mxu0 %v2112_v17 }
  0x43   :  { %1932 = vmatmul.mubr.f32.gmra.mrb[2].mxu0 %v153_v45 }
  0x44   :  { %1934 = vmatprep.mubr.f32.mxu0 %v163_v55  ;;  %2115 = vmatpush3.bf16.msra.mxu0 %v2112_v17 }
  0x45   :  { %2117 = vmatprep.subr.bf16.mxu0 %v2304_v14 }
  0x47   :  { %1935 = vmatmul.mubr.f32.gmra.mrb[4].mxu0 %v173_v56 }
  0x48   :  { %1937 = vmatprep.mubr.f32.mxu0 %v183_v11 }
  0x4b   :  { %1938 = vmatmul.mubr.f32.gmra.mrb[6].mxu0 %v193_v19 }
  0x4c   :  { %1948 = vmatprep.mubr.f32.mxu0 %v2306_v15 }
  0x4f   :  { %1949 = vmatmul.mubr.f32.vlgmr.msra.gmra.mrb[0].mxu0 %v2308_v16 }
  0x50   :  { %2119 = vmatpush3.bf16.msra.mxu0 %v2304_v14  ;;  %1951 = vmatprep.mubr.f32.mxu0 %v2332_v27  ;;  %v846_v14 = vld [vmem:[%s2601_s2] sm:$0xff] }
  0x51   :  { %2121 = vmatprep.subr.bf16.mxu0 %v2318_v20 }
  0x53   :  { %1952 = vmatmul.mubr.f32.gmra.mrb[2].mxu0 %v2336_v29 }
  0x54   :  { %1954 = vmatprep.mubr.f32.mxu0 %v2355_v38  ;;  %2123 = vmatpush3.bf16.msra.mxu0 %v2318_v20 }
  0x57   :  { %1955 = vmatmul.mubr.f32.gmra.mrb[4].mxu0 %v2357_v39 }
  0x58   :  { %1957 = vmatprep.mubr.f32.mxu0 %v2400_v1 }
  0x5b   :  { %1958 = vmatmul.mubr.f32.gmra.mrb[6].mxu0 %v2408_v7 }
  0x5c   :  { %1968 = vmatprep.mubr.f32.mxu0 %v2306_v15  ;;  %v847_v15 = vld [vmem:[%s2601_s2 + $0x8] sm:$0xff]  ;;  %s2255_s2 = smov [#allocation2]  }
  0x5d   :  { %v877_v20 = vand.u32 4294901760, %v847_v15  ;;  %s1678_s11 = sshll.u32 %s2255_s2, 4  ;;  %s1679_s11 = int_to_ptr.vmem [resolvable:$true] %s1678_s11 }
  0x5e   :  { %s2231_s12 = scalar_lea.vmem %s1679_s11, 512  ;;  %p2236_p1 = scmp.lt.s32.totalorder %s1679_s11, %s1679_s11 }
  0x5f   :  { %1969 = vmatmul.mubr.f32.vlgmr.msra.gmra.mrb[0].mxu0 %v2308_v16  ;;  %v874_v16 = vand.u32 4294901760, %v846_v14  ;;  %v1029_v25 = vsub.f32 %v847_v15, %v877_v20  ;;  %p2232_p0 = scmp.ne.s32.totalorder %s1679_s11, %s2231_s12  ;;  %p2237_p2 = scmp.lt.s32.totalorder %s2231_s12, %s2231_s12 }
  0x60   :  { %1971 = vmatprep.mubr.f32.mxu0 %v2332_v27 }
  0x61   :  { %v2478_v21 = vpack.c.bf16 %v877_v20, %v874_v16  ;;  %v1022_v24 = vsub.f32 %v846_v14, %v874_v16  ;;  %v1030_v27 = vand.u32 4294901760, %v1029_v25  ;;  %p2238_p3 = por %p2237_p2, %p2236_p1 }
  0x63   :  { %1972 = vmatmul.mubr.f32.gmra.mrb[2].mxu0 %v2336_v29  ;;  %2125 = vmatprep.subr.bf16.mxu1 %v2478_v21  ;;  %v1023_v26 = vand.u32 4294901760, %v1022_v24  ;;  %v1031_v29 = vsub.f32 %v1029_v25, %v1030_v27  ;;  %v2482_v37 = vpack.c.bf16 %v1029_v25, %v1022_v24  ;;  %p2239_p4 = pnand %p2238_p3, %p2232_p0 }
  0x64   :  { %1974 = vmatprep.mubr.f32.mxu0 %v2355_v38  ;;  %2127 = vmatpush3.bf16.msra.mxu1 %v2478_v21 }
  0x65   :  { %v1024_v28 = vsub.f32 %v1022_v24, %v1023_v26  ;;  %v1032_v33 = vand.u32 4294901760, %v1031_v29  ;;  %v2484_v38 = vpack.c.bf16 %v1030_v27, %v1023_v26 }
  0x67   :  { %1975 = vmatmul.mubr.f32.gmra.mrb[4].mxu0 %v2357_v39  ;;  %v1025_v32 = vand.u32 4294901760, %v1024_v28 }
  0x68   :  { %1977 = vmatprep.mubr.f32.mxu0 %v2400_v1 }
  0x69   :  { %v2128_v35 = vpack.c.bf16 %v1032_v33, %v1025_v32 }
  0x6b   :  { %1978 = vmatmul.mubr.f32.gmra.mrb[6].mxu0 %v2408_v7  ;;  %2129 = vmatprep.subr.bf16.mxu1 %v2128_v35 }
 0x132   :  { %v1970_v39 = vpop.f32.mrb[0].mxu0 }
 0x133   :  { %v839_v41 = vmax.f32 %v1970_v39, 0.0  ;;  %v792_v42 = vpop.f32.mrb[1].mxu0 }
 0x134   :  { %v838_v43 = vmax.f32 %v792_v42, 0.0 }
 0x135   :  { %v853_v44 = vsel %vm848_vm1, %v839_v41, 0 }
 0x136   :  { %v2487_v45 = vand.u32 4294901760, %v853_v44  ;;  %v850_v46 = vsel %vm848_vm1, %v838_v43, 0  ;;  %v1973_v47 = vpop.f32.mrb[2].mxu0 }
 0x137   :  { %v2490_v48 = vand.u32 4294901760, %v850_v46  ;;  %v841_v49 = vmax.f32 %v1973_v47, 0.0  ;;  %v804_v50 = vpop.f32.mrb[3].mxu0 }
 0x138   :  { %v2493_v51 = vsub.f32 %v853_v44, %v2487_v45  ;;  %v840_v52 = vmax.f32 %v804_v50, 0.0 }
 0x139   :  { %v2496_v53 = vsub.f32 %v850_v46, %v2490_v48  ;;  %v859_v54 = vsel %vm848_vm1, %v841_v49, 0 }
 0x13a   :  { %v2499_v55 = vand.u32 4294901760, %v859_v54  ;;  %v856_v56 = vsel %vm848_vm1, %v840_v52, 0  ;;  %v1976_v57 = vpop.f32.mrb[4].mxu0  ;;  %v952_v58 = vand.u32 4294901760, %v2493_v51 }
 0x13b   :  { %v2503_v59 = vand.u32 4294901760, %v856_v56  ;;  %v843_v60 = vmax.f32 %v1976_v57, 0.0  ;;  %v816_v61 = vpop.f32.mrb[5].mxu0  ;;  %v942_v62 = vand.u32 4294901760, %v2496_v53 }
 0x13c   :  { %v2507_v63 = vsub.f32 %v859_v54, %v2499_v55  ;;  %v842_v0 = vmax.f32 %v816_v61, 0.0  ;;  %v953_v1 = vsub.f32 %v2493_v51, %v952_v58 }
 0x13d   :  { %v2513_v2 = vsub.f32 %v856_v56, %v2503_v59  ;;  %v865_v3 = vsel %vm848_vm1, %v843_v60, 0  ;;  %v943_v4 = vsub.f32 %v2496_v53, %v942_v62 }
 0x13e   :  { %v2519_v5 = vand.u32 4294901760, %v865_v3  ;;  %v862_v6 = vsel %vm848_vm1, %v842_v0, 0  ;;  %v1979_v7 = vpop.f32.mrb[6].mxu0  ;;  %v972_v8 = vand.u32 4294901760, %v2507_v63  ;;  %v954_v22 = vand.u32 4294901760, %v953_v1 }
 0x13f   :  { %v2523_v9 = vand.u32 4294901760, %v862_v6  ;;  %v845_v10 = vmax.f32 %v1979_v7, 0.0  ;;  %v828_v11 = vpop.f32.mrb[7].mxu0  ;;  %v944_v12 = vand.u32 4294901760, %v943_v4  ;;  %v962_v13 = vand.u32 4294901760, %v2513_v2 }
 0x140   :  { %v2527_v18 = vsub.f32 %v865_v3, %v2519_v5  ;;  %v844_v19 = vmax.f32 %v828_v11, 0.0  ;;  %v973_v23 = vsub.f32 %v2507_v63, %v972_v8 }
 0x141   :  { %v981_v30 = vsub.f32 %v862_v6, %v2523_v9  ;;  %v871_v31 = vsel %vm848_vm1, %v845_v10, 0  ;;  %1984 = vmatprep.mubr.f32.mxu1 %v944_v12  ;;  %v963_v34 = vsub.f32 %v2513_v2, %v962_v13 }
 0x142   :  { %v2535_v36 = vand.u32 4294901760, %v871_v31  ;;  %v868_v40 = vsel %vm848_vm1, %v844_v19, 0  ;;  %1985 = vmatmul.mubr.f32.vlgmr.msra.gmra.mrb[0].mxu1 %v954_v22  ;;  %v992_v17 = vand.u32 4294901760, %v2527_v18  ;;  %v974_v24 = vand.u32 4294901760, %v973_v23 }
 0x143   :  { %v2539_v14 = vand.u32 4294901760, %v868_v40  ;;  %2131 = vmatpush3.bf16.msra.mxu1 %v2128_v35  ;;  %v964_v15 = vand.u32 4294901760, %v963_v34  ;;  %v982_v16 = vand.u32 4294901760, %v981_v30 }
 0x144   :  { %v1011_v20 = vsub.f32 %v871_v31, %v2535_v36  ;;  %v993_v25 = vsub.f32 %v2527_v18, %v992_v17  ;;  %2133 = vmatprep.subr.bf16.mxu1 %v2482_v37 }
 0x145   :  { %v1001_v26 = vsub.f32 %v868_v40, %v2539_v14  ;;  %1987 = vmatprep.mubr.f32.mxu1 %v964_v15  ;;  %v983_v27 = vsub.f32 %v981_v30, %v982_v16 }
 0x146   :  { %1988 = vmatmul.mubr.f32.gmra.mrb[2].mxu1 %v974_v24  ;;  %v1012_v28 = vand.u32 4294901760, %v1011_v20  ;;  %v994_v33 = vand.u32 4294901760, %v993_v25 }
 0x147   :  { %v984_v29 = vand.u32 4294901760, %v983_v27  ;;  %v1002_v32 = vand.u32 4294901760, %v1001_v26 }
 0x148   :  { %v1013_v39 = vsub.f32 %v1011_v20, %v1012_v28 }
 0x149   :  { %1990 = vmatprep.mubr.f32.mxu1 %v984_v29  ;;  %v1003_v35 = vsub.f32 %v1001_v26, %v1002_v32 }
 0x14a   :  { %1991 = vmatmul.mubr.f32.gmra.mrb[4].mxu1 %v994_v33  ;;  %v1014_v42 = vand.u32 4294901760, %v1013_v39 }
 0x14b   :  { %v1004_v41 = vand.u32 4294901760, %v1003_v35 }
 0x14d   :  { %1993 = vmatprep.mubr.f32.mxu1 %v1004_v41 }
 0x14e   :  { %1994 = vmatmul.mubr.f32.gmra.mrb[6].mxu1 %v1014_v42 }
 0x14f   :  { %2000 = vmatprep.mubr.f32.mxu1 %v2490_v48 }
 0x152   :  { %2001 = vmatmul.mubr.f32.vlgmr.msra.gmra.mrb[0].mxu1 %v2487_v45 }
 0x153   :  { %2003 = vmatprep.mubr.f32.mxu1 %v2503_v59  ;;  %2135 = vmatpush3.bf16.msra.mxu1 %v2482_v37 }
 0x154   :  { %2137 = vmatprep.subr.bf16.mxu1 %v2478_v21 }
 0x156   :  { %2004 = vmatmul.mubr.f32.gmra.mrb[2].mxu1 %v2499_v55 }
 0x157   :  { %2006 = vmatprep.mubr.f32.mxu1 %v2523_v9 }
 0x15a   :  { %2007 = vmatmul.mubr.f32.gmra.mrb[4].mxu1 %v2519_v5 }
 0x15b   :  { %2009 = vmatprep.mubr.f32.mxu1 %v2539_v14 }
 0x15e   :  { %2010 = vmatmul.mubr.f32.gmra.mrb[6].mxu1 %v2535_v36 }
 0x15f   :  { %2016 = vmatprep.mubr.f32.mxu1 %v2496_v53 }
 0x162   :  { %2017 = vmatmul.mubr.f32.vlgmr.msra.gmra.mrb[0].mxu1 %v2493_v51 }
 0x163   :  { %2019 = vmatprep.mubr.f32.mxu1 %v2513_v2  ;;  %2139 = vmatpush3.bf16.msra.mxu1 %v2478_v21 }
 0x164   :  { %2141 = vmatprep.subr.bf16.mxu1 %v2484_v38 }
 0x166   :  { %2020 = vmatmul.mubr.f32.gmra.mrb[2].mxu1 %v2507_v63 }
 0x167   :  { %2022 = vmatprep.mubr.f32.mxu1 %v981_v30 }
 0x16a   :  { %2023 = vmatmul.mubr.f32.gmra.mrb[4].mxu1 %v2527_v18 }
 0x16b   :  { %2025 = vmatprep.mubr.f32.mxu1 %v1001_v26 }
 0x16e   :  { %2026 = vmatmul.mubr.f32.gmra.mrb[6].mxu1 %v1011_v20 }
 0x16f   :  { %2032 = vmatprep.mubr.f32.mxu1 %v942_v62 }
 0x172   :  { %2033 = vmatmul.mubr.f32.vlgmr.msra.gmra.mrb[0].mxu1 %v952_v58 }
 0x173   :  { %2035 = vmatprep.mubr.f32.mxu1 %v962_v13  ;;  %2143 = vmatpush3.bf16.msra.mxu1 %v2484_v38 }
 0x174   :  { %2145 = vmatprep.subr.bf16.mxu1 %v2478_v21 }
 0x176   :  { %2036 = vmatmul.mubr.f32.gmra.mrb[2].mxu1 %v972_v8 }
 0x177   :  { %2038 = vmatprep.mubr.f32.mxu1 %v982_v16 }
 0x17a   :  { %2039 = vmatmul.mubr.f32.gmra.mrb[4].mxu1 %v992_v17 }
 0x17b   :  { %2041 = vmatprep.mubr.f32.mxu1 %v1002_v32 }
 0x17e   :  { %2042 = vmatmul.mubr.f32.gmra.mrb[6].mxu1 %v1012_v28 }
 0x17f   :  { %2048 = vmatprep.mubr.f32.mxu1 %v2490_v48 }
 0x182   :  { %2049 = vmatmul.mubr.f32.vlgmr.msra.gmra.mrb[0].mxu1 %v2487_v45 }
 0x183   :  { %2051 = vmatprep.mubr.f32.mxu1 %v2503_v59  ;;  %2147 = vmatpush3.bf16.msra.mxu1 %v2478_v21 }
 0x186   :  { %2052 = vmatmul.mubr.f32.gmra.mrb[2].mxu1 %v2499_v55 }
 0x187   :  { %2054 = vmatprep.mubr.f32.mxu1 %v2523_v9 }
 0x18a   :  { %2055 = vmatmul.mubr.f32.gmra.mrb[4].mxu1 %v2519_v5 }
 0x18b   :  { %2057 = vmatprep.mubr.f32.mxu1 %v2539_v14 }
 0x18e   :  { %2058 = vmatmul.mubr.f32.gmra.mrb[6].mxu1 %v2535_v36 }
 0x18f   :  { %2064 = vmatprep.mubr.f32.mxu1 %v2490_v48 }
 0x192   :  { %2065 = vmatmul.mubr.f32.vlgmr.msra.gmra.mrb[0].mxu1 %v2487_v45 }
 0x193   :  { %2067 = vmatprep.mubr.f32.mxu1 %v2503_v59 }
 0x196   :  { %2068 = vmatmul.mubr.f32.gmra.mrb[2].mxu1 %v2499_v55 }
 0x197   :  { %2070 = vmatprep.mubr.f32.mxu1 %v2523_v9 }
 0x19a   :  { %2071 = vmatmul.mubr.f32.gmra.mrb[4].mxu1 %v2519_v5 }
 0x19b   :  { %2073 = vmatprep.mubr.f32.mxu1 %v2539_v14 }
 0x19e   :  { %2074 = vmatmul.mubr.f32.gmra.mrb[6].mxu1 %v2535_v36 }
 0x265   :  { %v2066_v21 = vpop.f32.mrb[0].mxu1 }
 0x266   :  { %v1587_v37 = vpop.f32.mrb[1].mxu1 }
 0x267   :  { %v1708_v38 = vpack.c.bf16 %v2066_v21, %v1587_v37 }
 0x269   :  { %1709 = vst [vmem:[#allocation2] sm:$0xff] %v1708_v38   ;;  %v2069_v43 = vpop.f32.mrb[2].mxu1 }
 0x26a   :  { %v1599_v44 = vpop.f32.mrb[3].mxu1 }
 0x26b   :  { %v1713_v46 = vpack.c.bf16 %v2069_v43, %v1599_v44 }
 0x26d   :  { %1725 = vst [vmem:[#allocation2 + $0x8] sm:$0xff] %v1713_v46   ;;  %v2072_v45 = vpop.f32.mrb[4].mxu1 }
 0x26e   :  { %v1611_v47 = vpop.f32.mrb[5].mxu1 }
 0x26f   :  { %v1718_v48 = vpack.c.bf16 %v2072_v45, %v1611_v47 }
 0x271   :  { %1726 = vst [vmem:[#allocation2 + $0x10] sm:$0xff] %v1718_v48   ;;  %v2075_v49 = vpop.f32.mrb[6].mxu1 }
 0x272   :  { %v1623_v50 = vpop.f32.mrb[7].mxu1 }
 0x273   :  { %v1723_v51 = vpack.c.bf16 %v2075_v49, %v1623_v50 }
 0x275   :  { %1727 = vst [vmem:[#allocation2 + $0x18] sm:$0xff] %v1723_v51  }
 0x276   :  { %2242 = shalt.err (!%p2239_p4)
}
 0x277   :  { %s2243_s15 = scalar_lea.hbm %s2602_s3, 512 }
 0x278   :  { %p2244_p5 = scmp.ne.s32.totalorder %s2602_s3, %s2243_s15  ;;  %p2247_p6 = scmp.lt.u32.totalorder %s2243_s15, %s2602_s3 }
 0x27a   :  { %p2249_p7 = pnand %p2247_p6, %p2244_p5 }
 0x27c   :  { %2252 = shalt.err (!%p2249_p7)
}
 0x27d   :  { %s2256_s20 = smov 64   ;;  %s2257_s21 = smov 4  }
 0x27e   :  { %1684 = dma.vmem_to_hbm [thread:$0]  %s1679_s11, 512, %s2602_s3, [#allocation3], %s2256_s20, %s2256_s20, %s2257_s21  }
 0x27f   :  { %2253 = dma.done.wait [#allocation3], 512  }
 0x280   :  { %2254 = vsyncadd [#allocation3], 4294966784 }
 0x281   :  { %1688 = vsyncpa [#allocation3], 1 }

</bundles_post_ra>
